<compile_context>
chip_gen: v7x
topology: tpu7x:2x2x1
jax: 0.10.0
libtpu: 0.0.40
codegen_flags: <defaults>
</compile_context>

<pallas_src>
import functools

import jax
import jax.numpy as jnp
from jax.experimental import pallas as pl
from jax.experimental.pallas import tpu as pltpu


# ----------------------------------------------------------------------------
# Activation selection (mirrors espnet get_activation for the common choices)
# NOTE: J zero-padding below relies on act(0) == 0, true for all of these.
# ----------------------------------------------------------------------------
def get_activation(name: str):
    acts = {
        "tanh": jnp.tanh,
        "relu": lambda x: jnp.maximum(x, 0.0),
        "swish": lambda x: x * jax.nn.sigmoid(x),
        "hardtanh": lambda x: jnp.clip(x, -1.0, 1.0),
    }
    return acts[name]


def _round_up(x: int, m: int) -> int:
    return ((x + m - 1) // m) * m


def _choose_tile_and_pad(dim: int, cap: int, mult: int):
    """Pick a tile (multiple of `mult`, <= cap) and the padded dim (multiple
    of the tile). Prefers zero extra padding when a divisor near the cap
    exists; otherwise takes the cap and pads up."""
    cap = max(mult, (cap // mult) * mult)
    r = _round_up(dim, mult)
    if r <= cap:
        return r, r
    for t in range(cap, cap // 2, -mult):
        if r % t == 0:
            return t, r
    return cap, _round_up(dim, cap)


def _vmem_capacity_bytes() -> int:
    try:
        info = pltpu.get_tpu_info()
        cap = int(getattr(info, "vmem_capacity_bytes", 0) or 0)
        if cap > 0:
            return cap
    except Exception:
        pass
    return 64 * 1024 * 1024  # conservative default (v7x per-core VMEM)


def _vmem_estimate(tT, tU, tV, d_enc, d_dec, j_pad, out_bytes) -> int:
    """Rough per-step VMEM working-set estimate (bytes)."""
    est = 0
    est += 2 * tT * tU * tV * out_bytes      # double-buffered output block
    est += 2 * j_pad * tV * 2                # double-buffered bf16 w_out tile
    est += tT * tU * j_pad * 2               # cached bf16 activated intermediate
    est += tT * tU * j_pad * 4               # transient f32 broadcast-add temp
    est += tT * tU * tV * 4                  # transient f32 lin_out accumulator
    est += (tT + tU) * j_pad * 4             # enc_p / dec_p f32 scratch
    est += 4 * (d_enc + d_dec) * j_pad       # bf16 proj weights (x2 buffers)
    est += 8 * (tT * d_enc + tU * d_dec)     # f32 input blocks (x2 buffers)
    est += 16 * (j_pad + tV)                 # biases
    return est


# ----------------------------------------------------------------------------
# Pallas kernel: one grid step == one (b, t_tile, u_tile, v_tile) output block.
# ----------------------------------------------------------------------------
def joint_kernel(enc_ref, dec_ref, w_enc_ref, b_enc_ref, w_dec_ref,
                 w_out_ref, b_out_ref, out_ref,
                 enc_p_ref, dec_p_ref, h_ref, *, act):
    u_idx = pl.program_id(2)
    v_idx = pl.program_id(3)

    tT, J = enc_p_ref.shape
    tU = dec_p_ref.shape[0]
    tV = out_ref.shape[-1]

    # lin_enc projection: recompute only when the (b, t) tile changes.
    @pl.when((u_idx == 0) & (v_idx == 0))
    def _():
        enc_p_ref[...] = (
            jnp.dot(enc_ref[0].astype(w_enc_ref.dtype), w_enc_ref[...],
                    preferred_element_type=jnp.float32)
            + b_enc_ref[...])

    # lin_dec projection + broadcast-add + activation + bf16 cast: computed
    # ONCE per (b, t, u) tile and cached across all V tiles in h_ref.
    @pl.when(v_idx == 0)
    def _():
        dec_p_ref[...] = jnp.dot(dec_ref[0].astype(w_dec_ref.dtype),
                                 w_dec_ref[...],
                                 preferred_element_type=jnp.float32)
        # f32 broadcast-add + activation on VPU/EUP, then cast once to bf16.
        h = act(enc_p_ref[...][:, None, :] + dec_p_ref[...][None, :, :])
        h_ref[...] = h.reshape(tT * tU, J).astype(h_ref.dtype)

    # lin_out: one big-M MXU matmul per V tile, bf16 operands / f32 acc.
    z = jnp.dot(h_ref[...], w_out_ref[...], preferred_element_type=jnp.float32)
    z = z + b_out_ref[...]                               # (1, tV) broadcasts
    out_ref[0] = z.reshape(tT, tU, tV).astype(out_ref.dtype)


# ----------------------------------------------------------------------------
# Wrapper
# ----------------------------------------------------------------------------
def joint_network_forward(h_enc, h_dec, params, joint_activation_type="tanh",
                          out_dtype=None):
    """h_enc: (B, T, 1, D_enc), h_dec: (B, 1, U, D_dec) -> (B, T, U, V)."""
    act = get_activation(joint_activation_type)

    B, T, _, D_enc = h_enc.shape
    _, _, U, D_dec = h_dec.shape
    J = params["w_enc"].shape[0]
    V = params["w_out"].shape[0]

    if out_dtype is None:
        out_dtype = h_enc.dtype            # bf16 inputs -> bf16 writeback
    out_bytes = jnp.dtype(out_dtype).itemsize

    # glue: squeeze singleton axes; inputs stay f32 (cast to bf16 at the dot)
    enc = h_enc[:, :, 0, :].astype(jnp.float32)           # (B, T, D_enc)
    dec = h_dec[:, 0, :, :].astype(jnp.float32)           # (B, U, D_dec)

    # pad the joint dim J up to a lane multiple (exact: act(0)=0 and the
    # matching w_out rows are zero).
    J_pad = _round_up(J, 128)
    pad_j = J_pad - J

    # ---- generation-aware tile / VMEM budget selection ----------------------
    vmem_cap = _vmem_capacity_bytes()
    budget = int(0.55 * vmem_cap)          # headroom for compiler scratch
    vmem_limit = max(32 * 1024 * 1024,
                     min(int(0.75 * vmem_cap), vmem_cap - 2 * 1024 * 1024))

    tV, V_pad = _choose_tile_and_pad(V, 512, 128)

    tT, T_pad = 8, _round_up(T, 8)
    tU, U_pad = 8, _round_up(U, 8)
    for ct, cu in [(128, 64), (64, 64), (64, 32), (32, 32), (16, 16), (8, 8)]:
        tT_c, T_pad_c = _choose_tile_and_pad(T, ct, 8)
        tU_c, U_pad_c = _choose_tile_and_pad(U, cu, 8)
        if _vmem_estimate(tT_c, tU_c, tV, D_enc, D_dec,
                          J_pad, out_bytes) <= budget:
            tT, T_pad, tU, U_pad = tT_c, T_pad_c, tU_c, U_pad_c
            break

    # keep >= 2 parallel grid steps so a 2-TensorCore chip (v7x) is fully used
    if B * (T_pad // tT) < 2 and tT > 8:
        tT = max(8, _round_up(tT // 2, 8))
        T_pad = _round_up(T, tT)

    # ---- parameter prep: pre-transpose, zero-pad, bf16 weights --------------
    w_enc_t = jnp.pad(params["w_enc"].T.astype(jnp.float32),
                      ((0, 0), (0, pad_j))).astype(jnp.bfloat16)  # (D_enc, J_pad)
    w_dec_t = jnp.pad(params["w_dec"].T.astype(jnp.float32),
                      ((0, 0), (0, pad_j))).astype(jnp.bfloat16)  # (D_dec, J_pad)
    b_enc = jnp.pad(params["b_enc"].astype(jnp.float32),
                    (0, pad_j))[None, :]                          # (1, J_pad)
    w_out_t = jnp.pad(params["w_out"].T.astype(jnp.float32),
                      ((0, pad_j), (0, V_pad - V))).astype(jnp.bfloat16)
    b_out = jnp.pad(params["b_out"].astype(jnp.float32),
                    (0, V_pad - V))[None, :]                      # (1, V_pad)

    # ---- pad T / U so the tiles divide exactly (lane-dense, unmasked stores)
    if T_pad != T:
        enc = jnp.pad(enc, ((0, 0), (0, T_pad - T), (0, 0)))
    if U_pad != U:
        dec = jnp.pad(dec, ((0, 0), (0, U_pad - U), (0, 0)))

    grid = (B, T_pad // tT, U_pad // tU, V_pad // tV)
    kernel = functools.partial(joint_kernel, act=act)

    out_padded = pl.pallas_call(
        kernel,
        out_shape=jax.ShapeDtypeStruct((B, T_pad, U_pad, V_pad), out_dtype),
        grid_spec=pltpu.PrefetchScalarGridSpec(
            num_scalar_prefetch=0,
            grid=grid,
            in_specs=[
                pl.BlockSpec((1, tT, D_enc), lambda b, t, u, v: (b, t, 0)),
                pl.BlockSpec((1, tU, D_dec), lambda b, t, u, v: (b, u, 0)),
                pl.BlockSpec((D_enc, J_pad), lambda b, t, u, v: (0, 0)),
                pl.BlockSpec((1, J_pad), lambda b, t, u, v: (0, 0)),
                pl.BlockSpec((D_dec, J_pad), lambda b, t, u, v: (0, 0)),
                pl.BlockSpec((J_pad, tV), lambda b, t, u, v: (0, v)),
                pl.BlockSpec((1, tV), lambda b, t, u, v: (0, v)),
            ],
            out_specs=pl.BlockSpec((1, tT, tU, tV),
                                   lambda b, t, u, v: (b, t, u, v)),
            scratch_shapes=[
                pltpu.VMEM((tT, J_pad), jnp.float32),        # enc projection
                pltpu.VMEM((tU, J_pad), jnp.float32),        # dec projection
                pltpu.VMEM((tT * tU, J_pad), jnp.bfloat16),  # cached act(h)
            ],
        ),
        compiler_params=pltpu.CompilerParams(
            dimension_semantics=("parallel", "parallel",
                                 "arbitrary", "arbitrary"),
            vmem_limit_bytes=vmem_limit,
        ),
    )(enc, dec, w_enc_t, b_enc, w_dec_t, w_out_t, b_out)

    if (T_pad, U_pad, V_pad) != (T, U, V):
        out_padded = out_padded[:, :T, :U, :V]
    return out_padded


# ----------------------------------------------------------------------------
# Pure-JAX reference (f32 everywhere, for correctness check)
# ----------------------------------------------------------------------------
def joint_network_ref(h_enc, h_dec, params, joint_activation_type="tanh"):
    act = get_activation(joint_activation_type)
    enc_p = jnp.einsum("btid,jd->btij", h_enc, params["w_enc"]) + params["b_enc"]
    dec_p = jnp.einsum("biud,jd->biuj", h_dec, params["w_dec"])
    h = act(enc_p + dec_p)                      # (B, T, U, J) via broadcasting
    z = jnp.einsum("btuj,vj->btuv", h, params["w_out"]) + params["b_out"]
    return z


if __name__ == "__main__":
    # small, module-consistent shapes
    B, T, U = 2, 8, 8
    D_enc, D_dec = 32, 32
    J, V = 64, 128

    key = jax.random.PRNGKey(0)
    k = jax.random.split(key, 7)

    h_enc = jax.random.normal(k[0], (B, T, 1, D_enc), jnp.float32)
    h_dec = jax.random.normal(k[1], (B, 1, U, D_dec), jnp.float32)

    # deterministic synthetic parameters (PyTorch Linear stores W as (out, in))
    params = {
        "w_enc": jax.random.normal(k[2], (J, D_enc), jnp.float32) * 0.1,
        "b_enc": jax.random.normal(k[3], (J,), jnp.float32) * 0.1,
        "w_dec": jax.random.normal(k[4], (J, D_dec), jnp.float32) * 0.1,
        "w_out": jax.random.normal(k[5], (V, J), jnp.float32) * 0.1,
        "b_out": jax.random.normal(k[6], (V,), jnp.float32) * 0.1,
    }

    z = joint_network_forward(h_enc, h_dec, params, "tanh")
    z = jax.block_until_ready(z)

    z_ref = joint_network_ref(h_enc, h_dec, params, "tanh")
    assert z.shape == (B, T, U, V)
    # all three matmuls run with bf16 operands on the MXU (f32 accumulation)
    assert jnp.allclose(z, z_ref, atol=3e-2, rtol=2e-2)

    print("KERNEL_OK")
</pallas_src>

<mosaic_0001>
module attributes {stable_mosaic.version = 11 : i64} {
  func.func @joint_kernel(%arg0: i32, %arg1: i32, %arg2: i32, %arg3: i32, %arg4: memref<1x8x32xf32, #tpu.memory_space<vmem>>, %arg5: memref<1x8x32xf32, #tpu.memory_space<vmem>>, %arg6: memref<32x128xbf16, #tpu.memory_space<vmem>>, %arg7: memref<1x128xf32, #tpu.memory_space<vmem>>, %arg8: memref<32x128xbf16, #tpu.memory_space<vmem>>, %arg9: memref<128x128xbf16, #tpu.memory_space<vmem>>, %arg10: memref<1x128xf32, #tpu.memory_space<vmem>>, %arg11: memref<1x8x8x128xf32, #tpu.memory_space<vmem>>, %arg12: memref<8x128xf32, #tpu.memory_space<vmem>>, %arg13: memref<8x128xf32, #tpu.memory_space<vmem>>, %arg14: memref<64x128xbf16, #tpu.memory_space<vmem>>) attributes {dimension_semantics = [#tpu.dimension_semantics<parallel>, #tpu.dimension_semantics<parallel>, #tpu.dimension_semantics<arbitrary>, #tpu.dimension_semantics<arbitrary>], iteration_bounds = array<i64: 2, 1, 1, 1>, scalar_prefetch = 0 : i64, scratch_operands = 3 : i64, tpu.core_type = #tpu.core_type<tc>, window_params = [{transform_indices = @transform_0, window_bounds = array<i64: 1, 8, 32>}, {transform_indices = @transform_1, window_bounds = array<i64: 1, 8, 32>}, {pipeline_mode = #tpu.pipeline_mode<synchronous>, transform_indices = @transform_2, window_bounds = array<i64: 32, 128>}, {pipeline_mode = #tpu.pipeline_mode<synchronous>, transform_indices = @transform_3, window_bounds = array<i64: 1, 128>}, {pipeline_mode = #tpu.pipeline_mode<synchronous>, transform_indices = @transform_4, window_bounds = array<i64: 32, 128>}, {transform_indices = @transform_5, window_bounds = array<i64: 128, 128>}, {transform_indices = @transform_6, window_bounds = array<i64: 1, 128>}, {transform_indices = @transform_7, window_bounds = array<i64: 1, 8, 8, 128>}]} {
    %c0_i32 = arith.constant 0 : i32
    %0 = arith.cmpi eq, %arg2, %c0_i32 : i32
    %c0_i32_0 = arith.constant 0 : i32
    %1 = arith.cmpi eq, %arg3, %c0_i32_0 : i32
    %2 = arith.andi %0, %1 : i1
    %3 = arith.extui %2 : i1 to i32
    %c0_i32_1 = arith.constant 0 : i32
    %4 = arith.cmpi ne, %3, %c0_i32_1 : i32
    scf.if %4 {
      %c0_13 = arith.constant 0 : index
      %c0_14 = arith.constant 0 : index
      %c0_15 = arith.constant 0 : index
      %18 = vector.load %arg4[%c0_13, %c0_14, %c0_15] : memref<1x8x32xf32, #tpu.memory_space<vmem>>, vector<1x8x32xf32>
      %19 = vector.shape_cast %18 : vector<1x8x32xf32> to vector<8x32xf32>
      %20 = arith.truncf %19 : vector<8x32xf32> to vector<8x32xbf16>
      %c0_16 = arith.constant 0 : index
      %c0_17 = arith.constant 0 : index
      %21 = vector.load %arg6[%c0_16, %c0_17] : memref<32x128xbf16, #tpu.memory_space<vmem>>, vector<32x128xbf16>
      %cst_18 = arith.constant dense<0.000000e+00> : vector<8x128xf32>
      %22 = tpu.matmul %20, %21, %cst_18 {dimension_numbers = #tpu.dot_dimension_numbers<[1], [0], [0], [1], [0, 0, 1, 1], [], []>} : vector<8x32xbf16>, vector<32x128xbf16>, vector<8x128xf32> -> vector<8x128xf32>
      %c0_19 = arith.constant 0 : index
      %c0_20 = arith.constant 0 : index
      %23 = vector.load %arg7[%c0_19, %c0_20] : memref<1x128xf32, #tpu.memory_space<vmem>>, vector<1x128xf32>
      %24 = vector.broadcast %23 : vector<1x128xf32> to vector<8x128xf32>
      %25 = arith.addf %22, %24 : vector<8x128xf32>
      %c0_21 = arith.constant 0 : index
      %c0_22 = arith.constant 0 : index
      %26 = vector.load %arg12[%c0_21, %c0_22] : memref<8x128xf32, #tpu.memory_space<vmem>>, vector<8x128xf32>
      tpu.vector_store %arg12[%c0_21, %c0_22], %25 {strides = array<i32>} : memref<8x128xf32, #tpu.memory_space<vmem>>, vector<8x128xf32>,
    } else {
    }
    %c0_i32_2 = arith.constant 0 : i32
    %5 = arith.cmpi eq, %arg3, %c0_i32_2 : i32
    %6 = arith.extui %5 : i1 to i32
    %c0_i32_3 = arith.constant 0 : i32
    %7 = arith.cmpi ne, %6, %c0_i32_3 : i32
    scf.if %7 {
      %c0_13 = arith.constant 0 : index
      %c0_14 = arith.constant 0 : index
      %c0_15 = arith.constant 0 : index
      %18 = vector.load %arg5[%c0_13, %c0_14, %c0_15] : memref<1x8x32xf32, #tpu.memory_space<vmem>>, vector<1x8x32xf32>
      %19 = vector.shape_cast %18 : vector<1x8x32xf32> to vector<8x32xf32>
      %20 = arith.truncf %19 : vector<8x32xf32> to vector<8x32xbf16>
      %c0_16 = arith.constant 0 : index
      %c0_17 = arith.constant 0 : index
      %21 = vector.load %arg8[%c0_16, %c0_17] : memref<32x128xbf16, #tpu.memory_space<vmem>>, vector<32x128xbf16>
      %cst_18 = arith.constant dense<0.000000e+00> : vector<8x128xf32>
      %22 = tpu.matmul %20, %21, %cst_18 {dimension_numbers = #tpu.dot_dimension_numbers<[1], [0], [0], [1], [0, 0, 1, 1], [], []>} : vector<8x32xbf16>, vector<32x128xbf16>, vector<8x128xf32> -> vector<8x128xf32>
      %c0_19 = arith.constant 0 : index
      %c0_20 = arith.constant 0 : index
      %23 = vector.load %arg13[%c0_19, %c0_20] : memref<8x128xf32, #tpu.memory_space<vmem>>, vector<8x128xf32>
      tpu.vector_store %arg13[%c0_19, %c0_20], %22 {strides = array<i32>} : memref<8x128xf32, #tpu.memory_space<vmem>>, vector<8x128xf32>,
      %c0_21 = arith.constant 0 : index
      %c0_22 = arith.constant 0 : index
      %24 = vector.load %arg12[%c0_21, %c0_22] : memref<8x128xf32, #tpu.memory_space<vmem>>, vector<8x128xf32>
      %25 = vector.shape_cast %24 : vector<8x128xf32> to vector<8x1x128xf32>
      %c0_23 = arith.constant 0 : index
      %c0_24 = arith.constant 0 : index
      %26 = vector.load %arg13[%c0_23, %c0_24] : memref<8x128xf32, #tpu.memory_space<vmem>>, vector<8x128xf32>
      %27 = vector.shape_cast %26 : vector<8x128xf32> to vector<1x8x128xf32>
      %28 = vector.broadcast %25 : vector<8x1x128xf32> to vector<8x8x128xf32>
      %29 = vector.broadcast %27 : vector<1x8x128xf32> to vector<8x8x128xf32>
      %30 = arith.addf %28, %29 : vector<8x8x128xf32>
      %31 = math.tanh %30 : vector<8x8x128xf32>
      %32 = vector.shape_cast %31 : vector<8x8x128xf32> to vector<64x128xf32>
      %33 = arith.truncf %32 : vector<64x128xf32> to vector<64x128xbf16>
      %c0_25 = arith.constant 0 : index
      %c0_26 = arith.constant 0 : index
      %34 = vector.load %arg14[%c0_25, %c0_26] : memref<64x128xbf16, #tpu.memory_space<vmem>>, vector<64x128xbf16>
      tpu.vector_store %arg14[%c0_25, %c0_26], %33 {strides = array<i32>} : memref<64x128xbf16, #tpu.memory_space<vmem>>, vector<64x128xbf16>,
    } else {
    }
    %c0 = arith.constant 0 : index
    %c0_4 = arith.constant 0 : index
    %8 = vector.load %arg14[%c0, %c0_4] : memref<64x128xbf16, #tpu.memory_space<vmem>>, vector<64x128xbf16>
    %c0_5 = arith.constant 0 : index
    %c0_6 = arith.constant 0 : index
    %9 = vector.load %arg9[%c0_5, %c0_6] : memref<128x128xbf16, #tpu.memory_space<vmem>>, vector<128x128xbf16>
    %cst = arith.constant dense<0.000000e+00> : vector<64x128xf32>
    %10 = tpu.matmul %8, %9, %cst {dimension_numbers = #tpu.dot_dimension_numbers<[1], [0], [0], [1], [0, 0, 1, 1], [], []>} : vector<64x128xbf16>, vector<128x128xbf16>, vector<64x128xf32> -> vector<64x128xf32>
    %c0_7 = arith.constant 0 : index
    %c0_8 = arith.constant 0 : index
    %11 = vector.load %arg10[%c0_7, %c0_8] : memref<1x128xf32, #tpu.memory_space<vmem>>, vector<1x128xf32>
    %12 = vector.broadcast %11 : vector<1x128xf32> to vector<64x128xf32>
    %13 = arith.addf %10, %12 : vector<64x128xf32>
    %14 = vector.shape_cast %13 : vector<64x128xf32> to vector<8x8x128xf32>
    %c0_9 = arith.constant 0 : index
    %c0_10 = arith.constant 0 : index
    %c0_11 = arith.constant 0 : index
    %c0_12 = arith.constant 0 : index
    %15 = vector.load %arg11[%c0_9, %c0_10, %c0_11, %c0_12] : memref<1x8x8x128xf32, #tpu.memory_space<vmem>>, vector<1x8x8x128xf32>
    %16 = vector.shape_cast %15 : vector<1x8x8x128xf32> to vector<8x8x128xf32>
    %17 = vector.shape_cast %14 : vector<8x8x128xf32> to vector<1x8x8x128xf32>
    tpu.vector_store %arg11[%c0_9, %c0_10, %c0_11, %c0_12], %17 {strides = array<i32>} : memref<1x8x8x128xf32, #tpu.memory_space<vmem>>, vector<1x8x8x128xf32>,
    return
  }
  func.func @transform_0(%arg0: i32, %arg1: i32, %arg2: i32, %arg3: i32) -> (i32, i32, i32) {
    %c0_i32 = arith.constant 0 : i32
    %c0_i32_0 = arith.constant 0 : i32
    return %arg0, %arg1, %c0_i32 : i32, i32, i32
  }
  func.func @transform_1(%arg0: i32, %arg1: i32, %arg2: i32, %arg3: i32) -> (i32, i32, i32) {
    %c0_i32 = arith.constant 0 : i32
    %c0_i32_0 = arith.constant 0 : i32
    return %arg0, %arg2, %c0_i32 : i32, i32, i32
  }
  func.func @transform_2(%arg0: i32, %arg1: i32, %arg2: i32, %arg3: i32) -> (i32, i32) {
    %c0_i32 = arith.constant 0 : i32
    %c0_i32_0 = arith.constant 0 : i32
    %c0_i32_1 = arith.constant 0 : i32
    return %c0_i32, %c0_i32_0 : i32, i32
  }
  func.func @transform_3(%arg0: i32, %arg1: i32, %arg2: i32, %arg3: i32) -> (i32, i32) {
    %c0_i32 = arith.constant 0 : i32
    %c0_i32_0 = arith.constant 0 : i32
    %c0_i32_1 = arith.constant 0 : i32
    return %c0_i32, %c0_i32_0 : i32, i32
  }
  func.func @transform_4(%arg0: i32, %arg1: i32, %arg2: i32, %arg3: i32) -> (i32, i32) {
    %c0_i32 = arith.constant 0 : i32
    %c0_i32_0 = arith.constant 0 : i32
    %c0_i32_1 = arith.constant 0 : i32
    return %c0_i32, %c0_i32_0 : i32, i32
  }
  func.func @transform_5(%arg0: i32, %arg1: i32, %arg2: i32, %arg3: i32) -> (i32, i32) {
    %c0_i32 = arith.constant 0 : i32
    %c0_i32_0 = arith.constant 0 : i32
    return %c0_i32, %arg3 : i32, i32
  }
  func.func @transform_6(%arg0: i32, %arg1: i32, %arg2: i32, %arg3: i32) -> (i32, i32) {
    %c0_i32 = arith.constant 0 : i32
    %c0_i32_0 = arith.constant 0 : i32
    return %c0_i32, %arg3 : i32, i32
  }
  func.func @transform_7(%arg0: i32, %arg1: i32, %arg2: i32, %arg3: i32) -> (i32, i32, i32, i32) {
    %c0_i32 = arith.constant 0 : i32
    return %arg0, %arg1, %arg2, %arg3 : i32, i32, i32, i32
  }
}

</mosaic_0001>

<bundles_post_ra>
// kernel: tpu_custom_call.1
= control target key start
LH: loop header
LB: loop body
LE: loop exit
PB: predicated region body
PF: predicated region fallthrough
CT: control target
= control target key end

     0   :  { %s1870_s0 = inlined_call_operand.hbm [shape: f32[2,8,32], index: 0, kind: input, shape index: {}]   ;;  %s1871_s1 = inlined_call_operand.hbm [shape: f32[2,8,32], index: 1, kind: input, shape index: {}]   ;;  %s1872_s2 = inlined_call_operand.hbm [shape: bf16[32,128], index: 2, kind: input, shape index: {}]   ;;  %s1873_s3 = inlined_call_operand.vmem [shape: f32[1,128], index: 3, kind: input, shape index: {}]   ;;  %s1874_s4 = inlined_call_operand.hbm [shape: bf16[32,128], index: 4, kind: input, shape index: {}]   ;;  %s1875_s5 = inlined_call_operand.hbm [shape: bf16[128,128], index: 5, kind: input, shape index: {}]   ;;  %s1876_s6 = inlined_call_operand.vmem [shape: f32[1,128], index: 6, kind: input, shape index: {}]   ;;  %s1877_s7 = inlined_call_operand.hbm [shape: f32[2,8,8,128], index: 7, kind: output, shape index: {}]  }
   0x1   :  { %1885 = sst [smem:[#allocation22_spill]] %s1872_s2 }
   0x2   :  { %1886 = sst [smem:[#allocation23_spill]] %s1874_s4 }
   0x3   :  { %1887 = sst [smem:[#allocation24_spill]] %s1875_s5 }
   0x4   :  { %1888 = sst [smem:[#allocation25_spill]] %s1877_s7 }
   0x5   :  { %12 = vsyncpa [#allocation6], 0 }
   0x6   :  { %14 = vsyncpa [#allocation6 + $0x1], 0 }
   0x7   :  { %15 = vsyncpa [#allocation9], 0 }
   0x8   :  { %17 = vsyncpa [#allocation9 + $0x1], 0 }
   0x9   :  { %18 = vsyncpa [#allocation12], 0 }
   0xa   :  { %19 = vsyncpa [#allocation7], 0 }
   0xb   :  { %21 = vsyncpa [#allocation7 + $0x1], 0  ;;  %s1543_s24 = smov 0   ;;  %s1545_s25 = smov 0  }
   0xc   :  { %s1547_s26 = smov 0   ;;  %s1549_s27 = smov 0  }
   0xd   :  { %s1551_s28 = smov 0   ;;  %s1553_s29 = smov 0  }
   0xe LB: > { %1889 = sst [smem:[#allocation20_spill]] %s1468_s24  ;;  %s1574_s30 = sadd.s32 4294967295, %s1488_s29   ;;  %s1488_s29 = sphi %s1553_s29, %s27_s29   ;;  %s1484_s28 = sphi %s1551_s28, %s1918_s28   ;;  %s1480_s27 = sphi %s1549_s27, %s1917_s27   ;;  %s1476_s26 = sphi %s1547_s26, %s1916_s26   ;;  %s1472_s25 = sphi %s1545_s25, %s1915_s25   ;;  %s1468_s24 = sphi %s1543_s24, %s1914_s24  }
   0xf   : > { %s1019_s8 = sadd.s32 4294967294, %s1488_s29   ;;  %p75_p0 = scmp.ne.s32.totalorder %s1472_s25, %s1468_s24 }
  0x10   : > { %p1878_p1 = scmp.eq.s32.totalorder %s1574_s30, 0  ;;  %p254_p3 = scmp.eq.s32.totalorder %s1019_s8, 1 }
  0x11   : > { %p1020_p5 = scmp.ge.s32.totalorder %s1488_s29, 1  ;;  %p261_p7 = scmp.lt.s32.totalorder %s1488_s29, 3 }
  0x12   : > { %p1583_p4 = por %p1878_p1, %p75_p0  ;;  %p1588_p6 = por %p254_p3, %p75_p0 }
  0x13   : > { %p1593_p8 = pnand %p1020_p5, %p261_p7  ;;  %s1490_s12 = smov [#allocation10]  }
  0x14   : > { %s1890_s9 = scalar_select %p1583_p4, 1, 0 }
  0x15   : > { %s1891_s10 = scalar_select %p1588_p6, 1, 0 }
  0x16   : > { %s1893_s11 = scalar_select %p1593_p8, 1, 0 }
  0x17   : > { %1892 = sst [smem:[#allocation21_spill]] %s1891_s10  ;;  %s273_s13 = sshll.u32 %s1490_s12, 4  ;;  %s1597_s13 = int_to_ptr.vmem [resolvable:$true] %s273_s13 }
  0x18   : > { %p1135_p9 = pneg %p1593_p8  ;;  %s1491_s15 = smov [#allocation11]  }
  0x19   : > { %s289_s16 = sshll.u32 %s1491_s15, 4  ;;  %s1492_s17 = smov [#allocation13]   ;;  %s1608_s16 = int_to_ptr.vmem [resolvable:$true] %s289_s16 }
  0x1a   : > { %p1604_p11 = pnand %p1135_p9, %p1878_p1  ;;  %s1610_s18 = sshll.u32 %s1492_s17, 4  ;;  %s305_s18 = int_to_ptr.vmem [resolvable:$true] %s1610_s18 }
  0x1b   : > { %s1895_s2 = sld [smem:[#allocation22_spill]] }
  0x1c   : > { %p1620_p13 = pneg %p1604_p11 }
  0x21   : > { %s1250_s21 = scalar_lea.hbm %s1895_s2, 256 }
  0x22   : > { %p1251_p12 = scmp.ne.s32.totalorder %s1895_s2, %s1250_s21  ;;  %p1257_p5 = scmp.lt.u32.totalorder %s1250_s21, %s1895_s2 }
  0x24   : > { %p1253_p0 = pnand %p1620_p13, %p1251_p12 }
  0x26   : > { %p1254_p3 = pneg %p1253_p0 }
  0x28   : > { %p1259_p7 = pnand %p1257_p5, %p1254_p3 }
  0x2a   : > { %1262 = shalt.err (!%p1259_p7)
}
  0x2b   : > { %s1263_s17 = scalar_lea.vmem %s1597_s13, 256  ;;  %p1271_p2 = scmp.lt.s32.totalorder %s1597_s13, %s1597_s13 }
  0x2c   : > { %p1264_p9 = scmp.ne.s32.totalorder %s1597_s13, %s1263_s17  ;;  %p1272_p6 = scmp.lt.s32.totalorder %s1263_s17, %s1263_s17 }
  0x2e   : > { %p1266_p10 = pnand %p1264_p9, %p1620_p13  ;;  %p1273_p12 = por %p1272_p6, %p1271_p2 }
  0x30   : > { %p1267_p1 = pneg %p1266_p10 }
  0x32   : > { %p1274_p0 = pnand %p1273_p12, %p1267_p1 }
  0x34   : > { %1277 = shalt.err (!%p1274_p0)
}
  0x35   : > { %s1493_s19 = smov 64   ;;  %s1494_s20 = smov 4  }
  0x36   : > { %1138 = dma.hbm_to_vmem [thread:$0]  (!%p1604_p11), %s1895_s2, 256, %s1597_s13, [#allocation9], %s1493_s19, %s1493_s19, %s1494_s20  }
  0x37   : > { %s1897_s4 = sld [smem:[#allocation23_spill]] }
  0x3d   : > { %s1278_s15 = scalar_lea.hbm %s1897_s4, 256 }
  0x3e   : > { %p1279_p1 = scmp.ne.s32.totalorder %s1897_s4, %s1278_s15  ;;  %p1285_p10 = scmp.lt.u32.totalorder %s1278_s15, %s1897_s4 }
  0x40   : > { %p1281_p2 = pnand %p1279_p1, %p1620_p13 }
  0x42   : > { %p1282_p6 = pneg %p1281_p2 }
  0x44   : > { %p1287_p3 = pnand %p1285_p10, %p1282_p6 }
  0x46   : > { %1290 = shalt.err (!%p1287_p3)
}
  0x47   : > { %s1291_s13 = scalar_lea.vmem %s1608_s16, 256  ;;  %p1299_p12 = scmp.lt.s32.totalorder %s1608_s16, %s1608_s16 }
  0x48   : > { %p1292_p5 = scmp.ne.s32.totalorder %s1608_s16, %s1291_s13  ;;  %p1300_p0 = scmp.lt.s32.totalorder %s1291_s13, %s1291_s13 }
  0x4a   : > { %p1294_p7 = pnand %p1292_p5, %p1620_p13  ;;  %p1301_p1 = por %p1300_p0, %p1299_p12 }
  0x4c   : > { %p1295_p9 = pneg %p1294_p7 }
  0x4e   : > { %p1302_p2 = pnand %p1301_p1, %p1295_p9 }
  0x50   : > { %1305 = shalt.err (!%p1302_p2)
}
  0x51   : > { %1141 = dma.hbm_to_vmem [thread:$0]  (!%p1604_p11), %s1897_s4, 256, %s1608_s16, [#allocation12], %s1493_s19, %s1493_s19, %s1494_s20  }
  0x52   : > { %s1898_s5 = sld [smem:[#allocation24_spill]] }
  0x58   : > { %s1306_s22 = scalar_lea.hbm %s1898_s5, 1024 }
  0x59   : > { %p1307_p6 = scmp.ne.s32.totalorder %s1898_s5, %s1306_s22  ;;  %p1313_p5 = scmp.lt.u32.totalorder %s1306_s22, %s1898_s5 }
  0x5b   : > { %p1309_p10 = pnand %p1307_p6, %p1620_p13 }
  0x5d   : > { %p1310_p3 = pneg %p1309_p10 }
  0x5f   : > { %p1315_p7 = pnand %p1313_p5, %p1310_p3 }
  0x61   : > { %1318 = shalt.err (!%p1315_p7)
}
  0x62   : > { %s1319_s13 = scalar_lea.vmem %s305_s18, 1024  ;;  %p1327_p1 = scmp.lt.s32.totalorder %s305_s18, %s305_s18 }
  0x63   : > { %p1320_p9 = scmp.ne.s32.totalorder %s305_s18, %s1319_s13  ;;  %p1328_p2 = scmp.lt.s32.totalorder %s1319_s13, %s1319_s13 }
  0x65   : > { %p1322_p12 = pnand %p1320_p9, %p1620_p13  ;;  %p1329_p4 = por %p1328_p2, %p1327_p1 }
  0x67   : > { %p1323_p0 = pneg %p1322_p12 }
  0x69   : > { %p1330_p8 = pnand %p1329_p4, %p1323_p0 }
  0x6b   : > { %1333 = shalt.err (!%p1330_p8)
}
  0x6c   : > { %1144 = dma.hbm_to_vmem [thread:$0]  (!%p1604_p11), %s1898_s5, 1024, %s305_s18, [#allocation12], %s1493_s19, %s1493_s19, %s1494_s20  }
  0x6d   : > { %s62_s8 = sadd.s32 1, %s1476_s26  ;;  %s53_s14 = sadd.s32 1, %s1484_s28 }
  0x6e   : > { %p69_p4 = scmp.ne.s32.totalorder %s1476_s26, %s1472_s25  ;;  %p55_p8 = scmp.ge.s32.totalorder %s53_s14, 2 }
  0x6f   : > { %p70_p13 = scmp.eq.s32.totalorder %s1488_s29, 0  ;;  %p1899_p6 = scmp.eq.s32.totalorder %s1574_s30, 1 }
  0x70   : > { %p1159_p3 = scmp.lt.s32.totalorder %s1488_s29, 2  ;;  %s1920_s14 = smov (%p55_p8, %s53_s14), 0 }
  0x71   : > { %p1699_p10 = por %p1899_p6, %p69_p4  ;;  %p71_p5 = por %p70_p13, %p69_p4 }
  0x72   : > { %s324_s10 = sand.u32 1, %s1476_s26   ;;  %s57_s21 = ssub.s32 %s1484_s28, %s1920_s14 }
  0x73   : > { %s1900_s24 = scalar_select %p1699_p10, 1, 0 }
  0x74   : > { %p60_p11 = scmp.eq.s32.totalorder %s57_s21, 0  ;;  %s1709_s18 = sshll.u32 %s324_s10, 3 }
  0x75   : > { %s1027_s19 = sshll.u32 %s1484_s28, 7  ;;  %s328_s15 = scalar_lea.vmem [#allocation5], %s1709_s18 }
  0x76   : > { %s1713_s20 = scalar_select %p60_p11, %s1476_s26, %s62_s8  }
  0x77   : > { %s1718_s12 = scalar_lea.hbm %s1870_s0, %s1027_s19  ;;  %s336_s17 = sshll.u32 %s328_s15, 4  ;;  %s1721_s17 = int_to_ptr.vmem [resolvable:$true] %s336_s17 }
  0x78   : > { %p1725_p7 = pnand %p1159_p3, %p71_p5  ;;  %s1732_s8 = scalar_lea.hbm %s1871_s1, %s1027_s19 }
  0x79   : > { %s343_s21 = sand.u32 1, %s1488_s29   ;;  %s325_s22 = scalar_lea.sflag [#allocation6], %s324_s10 }
  0x7a   : > { %s1334_s23 = scalar_lea.hbm %s1718_s12, 128  ;;  %p1336_p12 = pneg %p1725_p7 }
  0x7b   : > { %p1335_p9 = scmp.ne.s32.totalorder %s1718_s12, %s1334_s23  ;;  %s1339_s4 = scalar_lea.hbm %s1870_s0, 256 }
  0x7c   : > { %p1340_p2 = scmp.lt.u32.totalorder %s1718_s12, %s1870_s0  ;;  %p1341_p4 = scmp.lt.u32.totalorder %s1339_s4, %s1334_s23 }
  0x7d   : > { %p1337_p0 = pnand %p1336_p12, %p1335_p9  ;;  %p1343_p13 = scmp.lt.u32.totalorder %s1334_s23, %s1718_s12 }
  0x7e   : > { %p1342_p8 = por %p1341_p4, %p1340_p2 }
  0x7f   : > { %p1338_p1 = pneg %p1337_p0 }
  0x80   : > { %p1344_p6 = por %p1343_p13, %p1342_p8 }
  0x82   : > { %p1345_p3 = pnand %p1344_p6, %p1338_p1 }
  0x84   : > { %1348 = shalt.err (!%p1345_p3)
}
  0x85   : > { %s1349_s10 = scalar_lea.vmem %s1721_s17, 128  ;;  %s1495_s2 = smov [#allocation5]  }
  0x86   : > { %p1350_p5 = scmp.ne.s32.totalorder %s1721_s17, %s1349_s10  ;;  %s1354_s19 = sshll.u32 %s1495_s2, 4  ;;  %s1355_s19 = int_to_ptr.vmem [resolvable:$false] %s1354_s19 }
  0x87   : > { %s1356_s5 = scalar_lea.vmem %s1355_s19, 256  ;;  %p1357_p0 = scmp.lt.s32.totalorder %s1721_s17, %s1355_s19 }
  0x88   : > { %p1352_p11 = pnand %p1350_p5, %p1336_p12  ;;  %p1358_p2 = scmp.lt.s32.totalorder %s1356_s5, %s1349_s10 }
  0x8a   : > { %p1353_p9 = pneg %p1352_p11  ;;  %p1359_p4 = por %p1358_p2, %p1357_p0 }
  0x8c   : > { %p1360_p8 = pnand %p1359_p4, %p1353_p9 }
  0x8e   : > { %1363 = shalt.err (!%p1360_p8)
}
  0x8f   : > { %1148 = dma.hbm_to_vmem [thread:$0]  (!%p1725_p7), %s1718_s12, 128, %s1721_s17, %s325_s22  }
  0x90   : > { %s347_s4 = scalar_lea.vmem [#allocation8], %s1709_s18  ;;  %s344_s23 = scalar_lea.sflag [#allocation9], %s343_s21 }
  0x91   : > { %s355_s7 = sshll.u32 %s347_s4, 4  ;;  %s1364_s15 = scalar_lea.hbm %s1732_s8, 128  ;;  %s356_s7 = int_to_ptr.vmem [resolvable:$true] %s355_s7 }
  0x92   : > { %p1365_p1 = scmp.ne.s32.totalorder %s1732_s8, %s1364_s15  ;;  %s1369_s2 = scalar_lea.hbm %s1871_s1, 256 }
  0x93   : > { %p1370_p3 = scmp.lt.u32.totalorder %s1732_s8, %s1871_s1  ;;  %p1371_p5 = scmp.lt.u32.totalorder %s1369_s2, %s1364_s15 }
  0x94   : > { %p1367_p13 = pnand %p1365_p1, %p1336_p12  ;;  %p1373_p9 = scmp.lt.u32.totalorder %s1364_s15, %s1732_s8 }
  0x95   : > { %p1372_p11 = por %p1371_p5, %p1370_p3 }
  0x96   : > { %p1368_p6 = pneg %p1367_p13 }
  0x97   : > { %p1374_p0 = por %p1373_p9, %p1372_p11 }
  0x99   : > { %p1375_p2 = pnand %p1374_p0, %p1368_p6 }
  0x9b   : > { %1378 = shalt.err (!%p1375_p2)
}
  0x9c   : > { %s1379_s18 = scalar_lea.vmem %s356_s7, 128  ;;  %s1496_s12 = smov [#allocation8]  }
  0x9d   : > { %p1380_p4 = scmp.ne.s32.totalorder %s356_s7, %s1379_s18  ;;  %s1384_s17 = sshll.u32 %s1496_s12, 4  ;;  %s1385_s17 = int_to_ptr.vmem [resolvable:$false] %s1384_s17 }
  0x9e   : > { %s1386_s21 = scalar_lea.vmem %s1385_s17, 256  ;;  %p1387_p13 = scmp.lt.s32.totalorder %s356_s7, %s1385_s17 }
  0x9f   : > { %p1382_p8 = pnand %p1380_p4, %p1336_p12  ;;  %p1388_p10 = scmp.lt.s32.totalorder %s1386_s21, %s1379_s18 }
  0xa1   : > { %p1383_p1 = pneg %p1382_p8  ;;  %p1389_p3 = por %p1388_p10, %p1387_p13 }
  0xa3   : > { %p1390_p5 = pnand %p1389_p3, %p1383_p1 }
  0xa5   : > { %1393 = shalt.err (!%p1390_p5)
}
  0xa6   : > { %1151 = dma.hbm_to_vmem [thread:$0]  (!%p1725_p7), %s1732_s8, 128, %s356_s7, %s344_s23  }
  0xa7   : > { %p1902_p6 = scmp.ne.s32.totalorder %s1893_s11, 0 }
  0xa8   : > { %s1785_s22 = sand.u32 (!%p1902_p6), 1, %s1472_s25   ;;  %p1903_p12 = scmp.ne.s32.totalorder (!%p1902_p6), %s1890_s9, 0 }
  0xa9   : > { %364 = sbr.rel (%p1902_p6) target bundleno = 676 (0x2a4), region = 48  ;;  %s1031_s4 = sshll.u32 (!%p1902_p6), %s1785_s22, 3 }
  0xaa   : > { %s367_s15 = scalar_lea.sflag (!%p1902_p6), [#allocation6], %s1785_s22  ;;  %s370_s16 = scalar_lea.vmem (!%p1902_p6), [#allocation5], %s1031_s4 }
  0xb0   : > { %1447 = dma.done.wait (%p1903_p12), %s367_s15, 128  }
  0xb1   : > { %1449 = vsyncadd (%p1903_p12), %s367_s15, 4294967168  ;;  %s375_s13 = sand.u32 1, %s1574_s30   ;;  %s379_s11 = scalar_lea.vmem [#allocation8], %s1031_s4 }
  0xb2   : > { %s376_s8 = scalar_lea.sflag [#allocation9], %s375_s13 }
  0xb3   : > { %1451 = dma.done.wait (%p1903_p12), %s376_s8, 128  }
  0xb4   : > { %1453 = vsyncadd (%p1903_p12), %s376_s8, 4294967168  ;;  %p1904_p10 = scmp.eq.s32.totalorder %s1574_s30, 0 }
  0xb6   : > { %1455 = dma.done.wait (%p1904_p10), [#allocation9], 256   ;;  %p1905_p7 = pmov %p1904_p10 }
  0xb8   : > { %1457 = vsyncadd (%p1905_p7), [#allocation9], 4294967040  ;;  %p1906_p11 = pmov %p1905_p7 }
  0xb9   : > { %p1907_p9 = pmov %p1905_p7 }
  0xba   : > { %1459 = dma.done.wait (%p1906_p11), [#allocation12], 1280  }
  0xbb   : > { %1461 = vsyncadd (%p1907_p9), [#allocation12], 4294966016  ;;  %v1497_v0 = vmov 0.0   ;;  %vm1498_vm0 = vmmov 0   ;;  %v1222_v1 = vld [vmem:[#allocation10] sm:$0xff]   ;;  %v1223_v2 = vld [vmem:[#allocation10 + $0x8] sm:$0xff]   ;;  %v583_v19 = vlaneseq }
  0xbc   : > { %1077 = vmatprep.subr.bf16.mxu1 %v1497_v0  ;;  %1081 = vmatprep.mubr.msk.bf16.mxu1 %vm1498_vm0, %v1497_v0  ;;  %v441_v3 = vld [vmem:[%s370_s16] sm:$0xff]  ;;  %vm466_vm1 = vcmask 261120   ;;  %v1224_v5 = vld [vmem:[#allocation11] sm:$0xff]   ;;  %v1225_v7 = vld [vmem:[#allocation11 + $0x8] sm:$0xff]   ;;  %v1499_v17 = vmov 1966171168  }
  0xbd   : > { %1078 = vmatpush3.bf16.msra.mxu1 %v1222_v1  ;;  %v442_v4 = vpack.c.bf16 %v441_v3, %v441_v3  ;;  %v1226_v6 = vld [vmem:[#allocation13] sm:$0xff]   ;;  %v514_v8 = vld [vmem:[%s379_s11] sm:$0xff]  ;;  %v1227_v10 = vld [vmem:[#allocation13 + $0x8] sm:$0xff]   ;;  %v581_v18 = vunpack.c.l.s4 %v1499_v17  ;;  %v584_v21 = vshrl.u32 %v583_v19, 7  ;;  %s1036_s7 = sshll.u32 %s1785_s22, 6  ;;  %s1058_s5 = sshll.u32 %s1480_s27, 10 }
  0xbe   : > { %1079 = vmatprep.subr.bf16.mxu1 %v1497_v0  ;;  %1093 = vmatprep.subr.bf16.mxu0 %v1226_v6  ;;  %v515_v9 = vpack.c.bf16 %v514_v8, %v514_v8  ;;  %v1228_v11 = vld [vmem:[#allocation13 + $0x10] sm:$0xff]   ;;  %v1229_v12 = vld [vmem:[#allocation13 + $0x18] sm:$0xff]   ;;  %v1230_v13 = vld [vmem:[#allocation13 + $0x20] sm:$0xff]   ;;  %s429_s2 = scalar_lea.vmem [#allocation14], %s1036_s7  ;;  %s1908_s17 = sld [smem:[#allocation25_spill]] }
  0xbf   : > { %1094 = vmatpush3.bf16.msra.mxu0 %v1226_v6  ;;  %v1231_v14 = vld [vmem:[#allocation13 + $0x28] sm:$0xff]   ;;  %v1232_v15 = vld [vmem:[#allocation13 + $0x30] sm:$0xff]   ;;  %v1233_v16 = vld [vmem:[#allocation13 + $0x38] sm:$0xff]   ;;  %v582_v20 = vunpack.c.0.s8 %v581_v18  ;;  %v631_v31 = vsub.s32 0, %v584_v21  ;;  %s859_s19 = sshll.u32 %s429_s2, 4  ;;  %s842_s27 = scalar_lea.sflag [#allocation7], %s1785_s22  ;;  %s1816_s19 = int_to_ptr.vmem [resolvable:$true] %s859_s19 }
  0xc0   : > { %1095 = vmatprep.subr.bf16.mxu0 %v1227_v10  ;;  %v1037_v22 = vld [vmem:[%s1873_s3] ss:$0 sm:$0xff]  ;;  %s1394_s4 = scalar_lea.vmem %s1816_s19, 1024  ;;  %p1909_p2 = scmp.ne.s32.totalorder %s1900_s24, 0 }
  0xc1   : > { %1080 = vmatpush3.bf16.msra.mxu1 %v1223_v2  ;;  %v585_v23 = vsub.s32 %v582_v20, %v584_v21  ;;  %p1395_p0 = scmp.ne.s32.totalorder %s1816_s19, %s1394_s4  ;;  %s1500_s15 = smov [#allocation14]  }
  0xc2   : > { %1085 = vmatprep.subr.bf16.mxu1 %v1497_v0  ;;  %s1398_s16 = sshll.u32 %s1500_s15, 4  ;;  %s1399_s16 = int_to_ptr.vmem [resolvable:$false] %s1398_s16 }
  0xc3   : > { %1096 = vmatpush3.bf16.msra.mxu0 %v1227_v10  ;;  %p1396_p4 = pnand %p1395_p0, %p1909_p2  ;;  %s1400_s13 = scalar_lea.vmem %s1399_s16, 2048 }
  0xc4   : > { %1082 = vmatmul.mubr.msk.bf16.vlgmr.msra.gmra.mrb[0].mxu1 %vm466_vm1, %v442_v4  ;;  %1097 = vmatprep.subr.bf16.mxu0 %v1228_v11  ;;  %s1821_s21 = scalar_lea.hbm %s1908_s17, %s1058_s5  ;;  %p1401_p1 = scmp.lt.s32.totalorder %s1816_s19, %s1399_s16 }
  0xc5   : > { %1086 = vmatpush3.bf16.msra.mxu1 %v1224_v5  ;;  %1089 = vmatprep.mubr.msk.bf16.mxu1 %vm1498_vm0, %v1497_v0  ;;  %p1397_p8 = pneg %p1396_p4  ;;  %p1402_p13 = scmp.lt.s32.totalorder %s1400_s13, %s1394_s4 }
  0xc6   : > { %1087 = vmatprep.subr.bf16.mxu1 %v1497_v0 }
  0xc7   : > { %1098 = vmatpush3.bf16.msra.mxu0 %v1228_v11  ;;  %v1044_v11 = vld [vmem:[%s1876_s6] ss:$0 sm:$0xff]  ;;  %p1403_p3 = por %p1402_p13, %p1401_p1 }
  0xc8   : > { %1099 = vmatprep.subr.bf16.mxu0 %v1229_v12 }
  0xc9   : > { %1088 = vmatpush3.bf16.msra.mxu1 %v1225_v7  ;;  %p1404_p5 = pnand %p1403_p3, %p1397_p8 }
  0xcb   : > { %1100 = vmatpush3.bf16.msra.mxu0 %v1229_v12 }
  0xcc   : > { %1090 = vmatmul.mubr.msk.bf16.vlgmr.msra.gmra.mrb[4].mxu1 %vm466_vm1, %v515_v9  ;;  %1101 = vmatprep.subr.bf16.mxu0 %v1230_v13 }
  0xcf   : > { %1102 = vmatpush3.bf16.msra.mxu0 %v1230_v13 }
  0xd0   : > { %1103 = vmatprep.subr.bf16.mxu0 %v1231_v14 }
  0xd3   : > { %1104 = vmatpush3.bf16.msra.mxu0 %v1231_v14 }
  0xd4   : > { %1105 = vmatprep.subr.bf16.mxu0 %v1232_v15 }
  0xd7   : > { %1106 = vmatpush3.bf16.msra.mxu0 %v1232_v15 }
  0xd8   : > { %1107 = vmatprep.subr.bf16.mxu0 %v1233_v16 }
  0xdb   : > { %1108 = vmatpush3.bf16.msra.mxu0 %v1233_v16 }
 0x197   : > { %v504_v24 = vpop.f32.mrb[0].mxu1 }
 0x198   : > { %v505_v25 = vadd.f32 %v1037_v22, %v504_v24  ;;  %v1083_v26 = vpop.f32.mrb[1].mxu1 }
 0x199   : > { %v507_v27 = vpop.f32.mrb[2].mxu1 }
 0x19a   : > { %v579_v28 = vcombine.high %v505_v25, %v505_v25  ;;  %v586_v29 = vrot.slane %v505_v25, %v585_v23  ;;  %v1084_v30 = vpop.f32.mrb[3].mxu1 }
 0x19c   : > { %v593_v32 = vrot.slane %v579_v28, %v585_v23  ;;  %v594_v33 = vcombine.high %v586_v29, %v586_v29  ;;  %v602_v34 = vrot.slane %v586_v29, %v585_v23 }
 0x19e   : > { %v595_v35 = vcombine.high %v593_v32, %v593_v32  ;;  %v609_v36 = vrot.slane %v593_v32, %v585_v23  ;;  %v616_v37 = vrot.slane %v594_v33, %v585_v23  ;;  %v624_v38 = vcombine.high %v602_v34, %v602_v34 }
 0x19f   : > { %v632_v39 = vrot.slane %v602_v34, %v631_v31  ;;  %v570_v40 = vpop.f32.mrb[4].mxu1 }
 0x1a0   : > { %v623_v41 = vrot.slane %v595_v35, %v585_v23  ;;  %v625_v42 = vcombine.high %v609_v36, %v609_v36  ;;  %v626_v43 = vcombine.high %v616_v37, %v616_v37  ;;  %v636_v44 = vrot.slane %v616_v37, %v631_v31  ;;  %v1091_v45 = vpop.f32.mrb[5].mxu1 }
 0x1a1   : > { %v640_v46 = vrot.slane %v624_v38, %v631_v31  ;;  %v648_v47 = vrot.slane %v609_v36, %v631_v31  ;;  %v573_v48 = vpop.f32.mrb[6].mxu1  ;;  %v669_v49 = vadd.f32 %v632_v39, %v570_v40 }
 0x1a2   : > { %v627_v50 = vcombine.high %v623_v41, %v623_v41  ;;  %v644_v51 = vrot.slane %v626_v43, %v631_v31  ;;  %v652_v52 = vrot.slane %v623_v41, %v631_v31  ;;  %v656_v53 = vrot.slane %v625_v42, %v631_v31  ;;  %v1092_v54 = vpop.f32.mrb[7].mxu1 }
 0x1a3   : > { %v670_v55 = vadd.f32 %v636_v44, %v570_v40  ;;  %1234 = vtanh.f32 %v669_v49  ;;  %v671_v56 = vadd.f32 %v640_v46, %v570_v40  ;;  %v673_v57 = vadd.f32 %v648_v47, %v570_v40 }
 0x1a4   : > { %v660_v58 = vrot.slane %v627_v50, %v631_v31  ;;  %v672_v59 = vadd.f32 %v644_v51, %v570_v40  ;;  %v674_v60 = vadd.f32 %v652_v52, %v570_v40  ;;  %v675_v61 = vadd.f32 %v656_v53, %v570_v40 }
 0x1a5   : > { %1236 = vtanh.f32 %v670_v55 }
 0x1a6   : > { %1238 = vtanh.f32 %v671_v56  ;;  %v676_v62 = vadd.f32 %v660_v58, %v570_v40 }
 0x1a7   : > { %1240 = vtanh.f32 %v672_v59 }
 0x1a8   : > { %1242 = vtanh.f32 %v673_v57 }
 0x1a9   : > { %1244 = vtanh.f32 %v674_v60 }
 0x1aa   : > { %1246 = vtanh.f32 %v675_v61 }
 0x1ab   : > { %1248 = vtanh.f32 %v676_v62 }
 0x1ad   : > { %v1235_v63 = vpop.eup %1234 }
 0x1af   : > { %v1237_v0 = vpop.eup %1236 }
 0x1b0   : > { %v1239_v1 = vpop.eup %1238  ;;  %v685_v2 = vpack.c.bf16 %v1237_v0, %v1235_v63 }
 0x1b1   : > { %v1241_v3 = vpop.eup %1240 }
 0x1b2   : > { %v1243_v4 = vpop.eup %1242  ;;  %1109 = vmatprep.mubr.bf16.mxu0 %v685_v2  ;;  %v686_v5 = vpack.c.bf16 %v1241_v3, %v1239_v1 }
 0x1b3   : > { %v1245_v6 = vpop.eup %1244 }
 0x1b4   : > { %v1247_v7 = vpop.eup %1246  ;;  %1110 = vmatmul.mubr.bf16.vlgmr.msra.gmra.mrb[0].mxu0 %v686_v5  ;;  %v687_v8 = vpack.c.bf16 %v1245_v6, %v1243_v4 }
 0x1b5   : > { %v1249_v9 = vpop.eup %1248 }
 0x1b6   : > { %1113 = vmatprep.mubr.bf16.mxu0 %v687_v8  ;;  %v688_v10 = vpack.c.bf16 %v1249_v9, %v1247_v7 }
 0x1bc   : > { %1114 = vmatmul.mubr.bf16.gmra.mrb[4].mxu0 %v688_v10 }
 0x287   : > { %v1111_v12 = vpop.f32.mrb[0].mxu0 }
 0x288   : > { %v811_v13 = vadd.f32 %v1111_v12, %v1044_v11  ;;  %v802_v14 = vpop.f32.mrb[1].mxu0 }
 0x289   : > { %v803_v15 = vadd.f32 %v1044_v11, %v802_v14  ;;  %v1112_v16 = vpop.f32.mrb[2].mxu0 }
 0x28a   : > { %835 = vst [vmem:[%s429_s2 + $0x10] sm:$0xff] %v811_v13  ;;  %v814_v17 = vadd.f32 %v1112_v16, %v1044_v11  ;;  %v805_v18 = vpop.f32.mrb[3].mxu0 }
 0x28b   : > { %833 = vst [vmem:[%s429_s2] sm:$0xff] %v803_v15  ;;  %v806_v19 = vadd.f32 %v1044_v11, %v805_v18 }
 0x28c   : > { %836 = vst [vmem:[%s429_s2 + $0x18] sm:$0xff] %v814_v17 }
 0x28d   : > { %834 = vst [vmem:[%s429_s2 + $0x8] sm:$0xff] %v806_v19 }
 0x28f   : > { %v1115_v20 = vpop.f32.mrb[4].mxu0 }
 0x290   : > { %v827_v21 = vadd.f32 %v1115_v20, %v1044_v11  ;;  %v818_v22 = vpop.f32.mrb[5].mxu0 }
 0x291   : > { %v819_v23 = vadd.f32 %v1044_v11, %v818_v22  ;;  %v1116_v24 = vpop.f32.mrb[6].mxu0 }
 0x292   : > { %839 = vst [vmem:[%s429_s2 + $0x30] sm:$0xff] %v827_v21  ;;  %v830_v25 = vadd.f32 %v1116_v24, %v1044_v11  ;;  %v821_v26 = vpop.f32.mrb[7].mxu0 }
 0x293   : > { %837 = vst [vmem:[%s429_s2 + $0x20] sm:$0xff] %v819_v23  ;;  %v822_v27 = vadd.f32 %v1044_v11, %v821_v26 }
 0x294   : > { %840 = vst [vmem:[%s429_s2 + $0x38] sm:$0xff] %v830_v25 }
 0x295   : > { %838 = vst [vmem:[%s429_s2 + $0x28] sm:$0xff] %v822_v27 }
 0x296   : > { %1407 = shalt.err (!%p1404_p5)
}
 0x297   : > { %s1408_s8 = scalar_lea.hbm %s1821_s21, 1024  ;;  %s1412_s9 = scalar_lea.hbm %s1908_s17, 2048 }
 0x298   : > { %p1409_p6 = scmp.ne.s32.totalorder %s1821_s21, %s1408_s8  ;;  %p1413_p7 = scmp.lt.u32.totalorder %s1821_s21, %s1908_s17 }
 0x299   : > { %p1414_p11 = scmp.lt.u32.totalorder %s1412_s9, %s1408_s8  ;;  %p1416_p0 = scmp.lt.u32.totalorder %s1408_s8, %s1821_s21 }
 0x29a   : > { %p1410_p12 = pnand %p1409_p6, %p1909_p2 }
 0x29b   : > { %p1415_p9 = por %p1414_p11, %p1413_p7 }
 0x29c   : > { %p1411_p10 = pneg %p1410_p12 }
 0x29d   : > { %p1417_p4 = por %p1416_p0, %p1415_p9 }
 0x29f   : > { %p1418_p8 = pnand %p1417_p4, %p1411_p10 }
 0x2a1   : > { %1421 = shalt.err (!%p1418_p8)
}
 0x2a2   : > { %s1501_s10 = smov 128   ;;  %s1502_s2 = smov 8  }
 0x2a3   : > { %1133 = dma.vmem_to_hbm [thread:$0]  (%p1909_p2), %s1816_s19, 1024, %s1821_s21, %s842_s27, %s1501_s10, %s1501_s10, %s1502_s2  }
 0x2a4 PF: > { %s1910_s5 = sld [smem:[#allocation20_spill]]  ;;  %s1911_s18 = sld [smem:[#allocation21_spill]] }
 0x2a5   : > { %p1913_p13 = scmp.ge.s32.totalorder %s1488_s29, 2 }
 0x2aa   : > { %s874_s12 = sand.u32 1, %s1910_s5   ;;  %p1912_p1 = scmp.ne.s32.totalorder %s1911_s18, 0 }
 0x2ab   : > { %s875_s4 = scalar_lea.sflag [#allocation7], %s874_s12 }
 0x2ac   : > { %p1153_p3 = pnand %p1913_p13, %p1912_p1 }
 0x2ae   : > { %1463 = dma.done.wait (!%p1153_p3), %s875_s4, 1024  }
 0x2af   : > { %1465 = vsyncadd (!%p1153_p3), %s875_s4, 4294966272  ;;  %s27_s29 = sadd.s32 1, %s1488_s29   ;;  %s1914_s24 = smov %s1472_s25 }
 0x2b0   : > { %p24_p5 = scmp.ge.s32.totalorder %s27_s29, 4   ;;  %s1915_s25 = smov %s1476_s26 }
 0x2b1   : > { %s1916_s26 = smov %s1713_s20  ;;  %s1917_s27 = smov %s1484_s28 }
 0x2b2   : > { %s1918_s28 = smov %s1920_s14  ;;  %26 = sbr.rel (!%p24_p5) target bundleno = 14 (0xe), region = 130 }
 0x2b9   :  { %880 = vsyncpa [#allocation6], 1 }
 0x2ba   :  { %882 = vsyncpa [#allocation6 + $0x1], 1 }
 0x2bb   :  { %883 = vsyncpa [#allocation9], 1 }
 0x2bc   :  { %885 = vsyncpa [#allocation9 + $0x1], 1 }
 0x2bd   :  { %886 = vsyncpa [#allocation12], 1 }
 0x2be   :  { %887 = vsyncpa [#allocation7], 1 }
 0x2bf   :  { %889 = vsyncpa [#allocation7 + $0x1], 1 }

</bundles_post_ra>
